<compile_context>
chip_gen: v6e
topology: v6e:2x2x1
jax: 0.10.0
libtpu: 0.0.40
codegen_flags: <defaults>
</compile_context>

<pallas_src>
import functools
import math

import jax
import jax.numpy as jnp
from jax.experimental import pallas as pl
from jax.experimental.pallas import tpu as pltpu

_LANE = 128          # lane width of the streamed slab
_TM_MAX = 2048       # max sublane rows per block: (2048, 128) f32 = 1 MiB / input / buffer
_LN2 = math.log(2.0)


def _detect_num_tensorcores():
    """2 on dual-TensorCore chips (v4 / v5p / v7x), else 1 (v5e / v6e)."""
    try:
        kind = jax.devices()[0].device_kind.lower()
    except Exception:
        return 1
    if "v7" in kind:
        # TODO(synk): verify on real v7x that the "parallel" leading axis actually lands
        # on both TensorCores (else switch that axis to pltpu.CORE_PARALLEL).
        return 2
    if ("v5p" in kind) or (kind.strip() == "tpu v5"):
        return 2
    if "v4" in kind and "lite" not in kind:
        return 2
    return 1


_NCORES = _detect_num_tensorcores()


def _row_align(dtype):
    """Sublane packing of `dtype`: rows per vreg tile (8 f32, 16 bf16, 32 int8/fp8)."""
    return 8 * max(1, 4 // jnp.dtype(dtype).itemsize)


def _stable_softplus_sum_jnp(x, sign):
    """Plain-JAX sum(softplus(sign*x)) in f32 (for <128-element tails / tiny inputs)."""
    x = x.astype(jnp.float32)
    m = jnp.maximum(x, 0.0) if sign > 0 else jnp.maximum(-x, 0.0)
    return jnp.sum(m + jnp.log1p(jnp.exp(-jnp.abs(x))))


def _softplus_sums_kernel(*refs, signs, rows, tm, inner, maybe_ragged):
    """Accumulates sum(softplus(sign_j * x_j)) for each input j.

    refs = (x_ref_0..x_ref_{k-1}, out_ref, acc_ref_0..acc_ref_{k-1})
    out_ref is a (1, k) SMEM block (one row per leading-axis "core" c), written only at
    the last inner step.  Invalid rows (partial boundary block / duplicated clamped
    block) are select-masked to 0; their softplus(0)=ln2 contribution is subtracted
    analytically in the wrapper.
    """
    k = len(signs)
    x_refs = refs[:k]
    out_ref = refs[k]
    acc_refs = refs[k + 1:]

    c = pl.program_id(0)
    i = pl.program_id(1)

    @pl.when(i == 0)
    def _init():
        for acc in acc_refs:
            acc[...] = jnp.zeros_like(acc)

    def block_partial(x, sign):
        # numerically-stable softplus(sign*x); |sign*x| == |x|, and the static sign is
        # folded into the max() term (no per-element multiply).
        # TODO(synk): on v7x (EUP-bound for bf16 inputs) evaluate exp(-|x|) in bf16
        # with f32 log1p/accumulation, only if it still passes 1e-4 tolerance.
        t = jnp.log1p(jnp.exp(-jnp.abs(x)))                          # EUP
        m = jnp.maximum(x, 0.0) if sign > 0 else jnp.maximum(-x, 0.0)
        sp = m + t
        # Fold sublane groups with plain VPU adds into an (8, LANE) partial; the 8->1
        # cross-sublane + cross-lane reduce is deferred to the finalize step.
        return jnp.sum(sp.reshape(tm // 8, 8, _LANE), axis=0)

    g = c * inner + i                                                # un-clamped block index

    if not maybe_ragged:
        # Every block fully in-bounds: lean body (stream, softplus, per-lane add).
        for x_ref, acc, sign in zip(x_refs, acc_refs, signs):
            acc[...] += block_partial(x_ref[...].astype(jnp.float32), sign)
    else:
        full = (g + 1) * tm <= rows

        @pl.when(full)
        def _full_block():
            for x_ref, acc, sign in zip(x_refs, acc_refs, signs):
                acc[...] += block_partial(x_ref[...].astype(jnp.float32), sign)

        @pl.when(jnp.logical_not(full))
        def _ragged_block():
            valid_rows = rows - g * tm                               # <= 0 for duplicated blocks
            row_ids = jax.lax.broadcasted_iota(jnp.int32, (tm, _LANE), 0)
            keep = row_ids < valid_rows
            for x_ref, acc, sign in zip(x_refs, acc_refs, signs):
                # select (not multiply) so DMA garbage NaN/Inf never reaches exp().
                x = jnp.where(keep, x_ref[...].astype(jnp.float32), 0.0)
                acc[...] += block_partial(x, sign)

    @pl.when(i == pl.num_programs(1) - 1)
    def _finalize():
        for j, acc in enumerate(acc_refs):
            out_ref[0, j] = jnp.sum(acc[...])


def _softplus_sums(xs, signs):
    """sum over all elements of softplus(sign_j * xs[j]) for each j (one fused kernel).

    All xs must have the same element count.  Returns a tuple of f32 scalars.
    """
    k = len(xs)
    flats = [jnp.reshape(x, (-1,)) for x in xs]                      # free contiguous flatten
    n = flats[0].shape[0]
    assert all(f.shape[0] == n for f in flats)

    row_align = max(_row_align(x.dtype) for x in xs)
    rows = n // _LANE                                                # full 128-lane rows
    n_tail = n - rows * _LANE

    if rows < row_align:
        # Tiny input (< one vreg tile of full rows): a kernel launch is pure overhead.
        return tuple(_stable_softplus_sum_jnp(f, s) for f, s in zip(flats, signs))

    if n_tail:
        # <128-element flat tail: plain jnp (negligible). The aligned prefix is a reshape
        # of a prefix slice; XLA may materialize that slice, but typical GAN-logit sizes
        # are multiples of 128 and take the zero-copy branch below.
        # TODO(synk): truly copy-free ragged handling needs 1-D partial boundary blocks.
        tails = [_stable_softplus_sum_jnp(f[rows * _LANE:], s) for f, s in zip(flats, signs)]
        slabs = [f[: rows * _LANE].reshape(rows, _LANE) for f in flats]
    else:
        tails = [jnp.float32(0.0)] * k
        slabs = [f.reshape(rows, _LANE) for f in flats]              # zero-copy reshape

    ncores = _NCORES
    tm = min(_TM_MAX, (rows // row_align) * row_align)
    num_blocks = -(-rows // tm)
    inner = -(-num_blocks // ncores)
    covered_rows = ncores * inner * tm                               # rows summed incl. masked
    maybe_ragged = covered_rows != rows

    def in_map(c, i):
        # Clamp so duplicated / out-of-range blocks re-read the last block (fully masked).
        return (jnp.minimum(c * inner + i, num_blocks - 1), 0)

    kernel = functools.partial(
        _softplus_sums_kernel, signs=tuple(float(s) for s in signs),
        rows=rows, tm=tm, inner=inner, maybe_ragged=maybe_ragged)

    n_main = rows * _LANE
    cost = pl.CostEstimate(
        flops=int(5 * n_main * k),
        transcendentals=int(2 * n_main * k),
        bytes_accessed=int(sum(s.size * s.dtype.itemsize for s in slabs) + 4 * ncores * k))

    # NOTE: pipeline_mode=pl.Buffered(3) on in_specs is a cheap follow-up if an xprof
    # trace ever shows exposed DMA at step boundaries; default double-buffering kept here.
    partial_sums = pl.pallas_call(
        kernel,
        out_shape=jax.ShapeDtypeStruct((ncores, k), jnp.float32),
        grid=(ncores, inner),
        in_specs=[pl.BlockSpec((tm, _LANE), in_map) for _ in range(k)],
        out_specs=pl.BlockSpec((1, k), lambda c, i: (c, 0),
                               memory_space=pltpu.MemorySpace.SMEM),
        scratch_shapes=[pltpu.VMEM((8, _LANE), jnp.float32) for _ in range(k)],
        compiler_params=pltpu.CompilerParams(
            dimension_semantics=("parallel", "arbitrary")),
        cost_estimate=cost,
    )(*slabs)

    totals = jnp.sum(partial_sums, axis=0)                           # add per-core partials
    # Every masked element was forced to 0 before softplus and contributed exactly ln2.
    correction = jnp.float32((covered_rows - rows) * _LANE * _LN2)
    return tuple(totals[j] - correction + tails[j] for j in range(k))


def minmax_loss(pred_real, pred_fake=None):
    """JAX/Pallas equivalent of MinMax.forward."""
    pred_real = jnp.asarray(pred_real)
    if pred_fake is not None:
        pred_fake = jnp.asarray(pred_fake)
        if pred_real.size == pred_fake.size:
            # fused: one kernel launch streams both tensors
            s_real, s_fake = _softplus_sums([pred_real, pred_fake], [-1.0, 1.0])
        else:  # uncommon: different element counts -> two launches
            (s_real,) = _softplus_sums([pred_real], [-1.0])
            (s_fake,) = _softplus_sums([pred_fake], [1.0])
        return s_real / pred_real.size + s_fake / pred_fake.size
    (s,) = _softplus_sums([pred_real], [1.0])
    return -(s / pred_real.size)


# ---------------------------------------------------------------------------- reference
def _ref_softplus_mean(x, sign):
    x = jnp.ravel(x).astype(jnp.float32) * sign
    return jnp.mean(jnp.maximum(x, 0.0) + jnp.log1p(jnp.exp(-jnp.abs(x))))


def _ref_minmax(pred_real, pred_fake=None):
    if pred_fake is not None:
        return _ref_softplus_mean(pred_real, -1.0) + _ref_softplus_mean(pred_fake, 1.0)
    return -_ref_softplus_mean(pred_real, 1.0)


if __name__ == "__main__":
    key = jax.random.PRNGKey(0)
    k1, k2, k3, k4, k5 = jax.random.split(key, 5)

    # discriminator-logit shaped inputs (NCHW): lane-aligned, zero-copy kernel path
    pred_real = jax.random.normal(k1, (2, 4, 16, 16), dtype=jnp.float32)
    pred_fake = jax.random.normal(k2, (2, 4, 16, 16), dtype=jnp.float32)

    loss_d = minmax_loss(pred_real, pred_fake)      # discriminator branch (fused call)
    loss_g = minmax_loss(pred_real)                 # generator branch
    jax.block_until_ready((loss_d, loss_g))
    assert jnp.allclose(loss_d, _ref_minmax(pred_real, pred_fake), atol=1e-4, rtol=1e-4), loss_d
    assert jnp.allclose(loss_g, _ref_minmax(pred_real), atol=1e-4, rtol=1e-4), loss_g

    # lane-aligned but row-ragged: partial boundary block masked in-kernel + ln2 correction
    pr_rag = jax.random.normal(k3, (3, 5, 24, 64), dtype=jnp.float32)
    pf_rag = jax.random.normal(k4, (3, 5, 24, 64), dtype=jnp.float32)
    loss_rag = minmax_loss(pr_rag, pf_rag)
    jax.block_until_ready(loss_rag)
    assert jnp.allclose(loss_rag, _ref_minmax(pr_rag, pf_rag), atol=1e-4, rtol=1e-4), loss_rag

    # lane-ragged: kernel on the aligned prefix + plain-jnp <128-element tail
    pred_lr = jax.random.normal(k5, (2, 3, 17, 19), dtype=jnp.float32)
    loss_lr = minmax_loss(pred_lr)
    jax.block_until_ready(loss_lr)
    assert jnp.allclose(loss_lr, _ref_minmax(pred_lr), atol=1e-4, rtol=1e-4), loss_lr

    # tiny input (< one tile of full rows): pure-jnp fallback path
    pred_tiny = jax.random.normal(k3, (2, 1, 15, 15), dtype=jnp.float32)
    loss_tiny = minmax_loss(pred_tiny)
    jax.block_until_ready(loss_tiny)
    assert jnp.allclose(loss_tiny, _ref_minmax(pred_tiny), atol=1e-4, rtol=1e-4), loss_tiny

    # bf16 logits stream natively from HBM (cast to f32 inside the kernel)
    pr_bf, pf_bf = pred_real.astype(jnp.bfloat16), pred_fake.astype(jnp.bfloat16)
    loss_bf16 = minmax_loss(pr_bf, pf_bf)
    jax.block_until_ready(loss_bf16)
    assert jnp.allclose(loss_bf16, _ref_minmax(pr_bf, pf_bf), atol=1e-4, rtol=1e-4), loss_bf16

    print("KERNEL_OK")
</pallas_src>

<mosaic_0001>
module attributes {stable_mosaic.version = 11 : i64} {
  func.func @_softplus_sums_kernel(%arg0: i32, %arg1: i32, %arg2: memref<16x128xf32, #tpu.memory_space<vmem>>, %arg3: memref<16x128xf32, #tpu.memory_space<vmem>>, %arg4: memref<1x2xf32, #tpu.memory_space<smem>>, %arg5: memref<8x128xf32, #tpu.memory_space<vmem>>, %arg6: memref<8x128xf32, #tpu.memory_space<vmem>>) attributes {dimension_semantics = [#tpu.dimension_semantics<parallel>, #tpu.dimension_semantics<arbitrary>], iteration_bounds = array<i64: 1, 1>, scalar_prefetch = 0 : i64, scratch_operands = 2 : i64, tpu.core_type = #tpu.core_type<tc>, window_params = [{transform_indices = @transform_0, window_bounds = array<i64: 16, 128>}, {transform_indices = @transform_1, window_bounds = array<i64: 16, 128>}, {transform_indices = @transform_2, window_bounds = array<i64: 1, 2>}]} {
    %c0_i32 = arith.constant 0 : i32
    %0 = arith.cmpi eq, %arg1, %c0_i32 : i32
    %1 = arith.extui %0 : i1 to i32
    %c0_i32_0 = arith.constant 0 : i32
    %2 = arith.cmpi ne, %1, %c0_i32_0 : i32
    scf.if %2 {
      %cst_20 = arith.constant 0.000000e+00 : f32
      %36 = vector.broadcast %cst_20 : f32 to vector<8x128xf32>
      %c0_21 = arith.constant 0 : index
      %c0_22 = arith.constant 0 : index
      %37 = vector.load %arg5[%c0_21, %c0_22] : memref<8x128xf32, #tpu.memory_space<vmem>>, vector<8x128xf32>
      tpu.vector_store %arg5[%c0_21, %c0_22], %36 {strides = array<i32>} : memref<8x128xf32, #tpu.memory_space<vmem>>, vector<8x128xf32>,
      %cst_23 = arith.constant 0.000000e+00 : f32
      %38 = vector.broadcast %cst_23 : f32 to vector<8x128xf32>
      %c0_24 = arith.constant 0 : index
      %c0_25 = arith.constant 0 : index
      %39 = vector.load %arg6[%c0_24, %c0_25] : memref<8x128xf32, #tpu.memory_space<vmem>>, vector<8x128xf32>
      tpu.vector_store %arg6[%c0_24, %c0_25], %38 {strides = array<i32>} : memref<8x128xf32, #tpu.memory_space<vmem>>, vector<8x128xf32>,
    } else {
    }
    %c0 = arith.constant 0 : index
    %c0_1 = arith.constant 0 : index
    %3 = vector.load %arg5[%c0, %c0_1] : memref<8x128xf32, #tpu.memory_space<vmem>>, vector<8x128xf32>
    %c0_2 = arith.constant 0 : index
    %c0_3 = arith.constant 0 : index
    %4 = vector.load %arg2[%c0_2, %c0_3] : memref<16x128xf32, #tpu.memory_space<vmem>>, vector<16x128xf32>
    %5 = math.absf %4 : vector<16x128xf32>
    %cst = arith.constant 0.000000e+00 : f32
    %6 = vector.broadcast %cst : f32 to vector<16x128xf32>
    %7 = arith.subf %6, %5 : vector<16x128xf32>
    %8 = math.exp %7 : vector<16x128xf32>
    %9 = math.log1p %8 : vector<16x128xf32>
    %cst_4 = arith.constant 0.000000e+00 : f32
    %10 = vector.broadcast %cst_4 : f32 to vector<16x128xf32>
    %11 = arith.subf %10, %4 : vector<16x128xf32>
    %cst_5 = arith.constant 0.000000e+00 : f32
    %12 = vector.broadcast %cst_5 : f32 to vector<16x128xf32>
    %13 = arith.maximumf %11, %12 : vector<16x128xf32>
    %14 = arith.addf %13, %9 : vector<16x128xf32>
    %15 = vector.shape_cast %14 : vector<16x128xf32> to vector<2x8x128xf32>
    %cst_6 = arith.constant dense<0.000000e+00> : vector<8x128xf32>
    %16 = vector.multi_reduction <add>, %15, %cst_6 [0] : vector<2x8x128xf32> to vector<8x128xf32>
    %17 = arith.addf %3, %16 : vector<8x128xf32>
    %c0_7 = arith.constant 0 : index
    %c0_8 = arith.constant 0 : index
    %18 = vector.load %arg5[%c0_7, %c0_8] : memref<8x128xf32, #tpu.memory_space<vmem>>, vector<8x128xf32>
    tpu.vector_store %arg5[%c0_7, %c0_8], %17 {strides = array<i32>} : memref<8x128xf32, #tpu.memory_space<vmem>>, vector<8x128xf32>,
    %c0_9 = arith.constant 0 : index
    %c0_10 = arith.constant 0 : index
    %19 = vector.load %arg6[%c0_9, %c0_10] : memref<8x128xf32, #tpu.memory_space<vmem>>, vector<8x128xf32>
    %c0_11 = arith.constant 0 : index
    %c0_12 = arith.constant 0 : index
    %20 = vector.load %arg3[%c0_11, %c0_12] : memref<16x128xf32, #tpu.memory_space<vmem>>, vector<16x128xf32>
    %21 = math.absf %20 : vector<16x128xf32>
    %cst_13 = arith.constant 0.000000e+00 : f32
    %22 = vector.broadcast %cst_13 : f32 to vector<16x128xf32>
    %23 = arith.subf %22, %21 : vector<16x128xf32>
    %24 = math.exp %23 : vector<16x128xf32>
    %25 = math.log1p %24 : vector<16x128xf32>
    %cst_14 = arith.constant 0.000000e+00 : f32
    %26 = vector.broadcast %cst_14 : f32 to vector<16x128xf32>
    %27 = arith.maximumf %20, %26 : vector<16x128xf32>
    %28 = arith.addf %27, %25 : vector<16x128xf32>
    %29 = vector.shape_cast %28 : vector<16x128xf32> to vector<2x8x128xf32>
    %cst_15 = arith.constant dense<0.000000e+00> : vector<8x128xf32>
    %30 = vector.multi_reduction <add>, %29, %cst_15 [0] : vector<2x8x128xf32> to vector<8x128xf32>
    %31 = arith.addf %19, %30 : vector<8x128xf32>
    %c0_16 = arith.constant 0 : index
    %c0_17 = arith.constant 0 : index
    %32 = vector.load %arg6[%c0_16, %c0_17] : memref<8x128xf32, #tpu.memory_space<vmem>>, vector<8x128xf32>
    tpu.vector_store %arg6[%c0_16, %c0_17], %31 {strides = array<i32>} : memref<8x128xf32, #tpu.memory_space<vmem>>, vector<8x128xf32>,
    %c0_i32_18 = arith.constant 0 : i32
    %33 = arith.cmpi eq, %arg1, %c0_i32_18 : i32
    %34 = arith.extui %33 : i1 to i32
    %c0_i32_19 = arith.constant 0 : i32
    %35 = arith.cmpi ne, %34, %c0_i32_19 : i32
    scf.if %35 {
      %c0_20 = arith.constant 0 : index
      %c0_21 = arith.constant 0 : index
      %36 = vector.load %arg5[%c0_20, %c0_21] : memref<8x128xf32, #tpu.memory_space<vmem>>, vector<8x128xf32>
      %37 = vector.shape_cast %36 : vector<8x128xf32> to vector<1x8x128xf32>
      %cst_22 = arith.constant dense<0.000000e+00> : vector<1xf32>
      %38 = vector.multi_reduction <add>, %37, %cst_22 [1, 2] : vector<1x8x128xf32> to vector<1xf32>
      %39 = vector.shape_cast %38 : vector<1xf32> to vector<1x1x1xf32>
      %40 = vector.extract %39[0, 0, 0] : f32 from vector<1x1x1xf32>
      %c0_23 = arith.constant 0 : index
      %c0_24 = arith.constant 0 : index
      %41 = memref.load %arg4[%c0_23, %c0_24] : memref<1x2xf32, #tpu.memory_space<smem>>
      memref.store %40, %arg4[%c0_23, %c0_24] : memref<1x2xf32, #tpu.memory_space<smem>>
      %c0_25 = arith.constant 0 : index
      %c0_26 = arith.constant 0 : index
      %42 = vector.load %arg6[%c0_25, %c0_26] : memref<8x128xf32, #tpu.memory_space<vmem>>, vector<8x128xf32>
      %43 = vector.shape_cast %42 : vector<8x128xf32> to vector<1x8x128xf32>
      %cst_27 = arith.constant dense<0.000000e+00> : vector<1xf32>
      %44 = vector.multi_reduction <add>, %43, %cst_27 [1, 2] : vector<1x8x128xf32> to vector<1xf32>
      %45 = vector.shape_cast %44 : vector<1xf32> to vector<1x1x1xf32>
      %46 = vector.extract %45[0, 0, 0] : f32 from vector<1x1x1xf32>
      %c0_28 = arith.constant 0 : index
      %c1 = arith.constant 1 : index
      %47 = memref.load %arg4[%c0_28, %c1] : memref<1x2xf32, #tpu.memory_space<smem>>
      memref.store %46, %arg4[%c0_28, %c1] : memref<1x2xf32, #tpu.memory_space<smem>>
    } else {
    }
    return
  }
  func.func @transform_0(%arg0: i32, %arg1: i32) -> (i32, i32) {
    %c1_i32 = arith.constant 1 : i32
    %0 = arith.muli %arg0, %c1_i32 : i32
    %1 = arith.addi %0, %arg1 : i32
    %c0_i32 = arith.constant 0 : i32
    %2 = arith.minsi %1, %c0_i32 : i32
    %c0_i32_0 = arith.constant 0 : i32
    %c0_i32_1 = arith.constant 0 : i32
    return %2, %c0_i32_0 : i32, i32
  }
  func.func @transform_1(%arg0: i32, %arg1: i32) -> (i32, i32) {
    %c1_i32 = arith.constant 1 : i32
    %0 = arith.muli %arg0, %c1_i32 : i32
    %1 = arith.addi %0, %arg1 : i32
    %c0_i32 = arith.constant 0 : i32
    %2 = arith.minsi %1, %c0_i32 : i32
    %c0_i32_0 = arith.constant 0 : i32
    %c0_i32_1 = arith.constant 0 : i32
    return %2, %c0_i32_0 : i32, i32
  }
  func.func @transform_2(%arg0: i32, %arg1: i32) -> (i32, i32) {
    %c0_i32 = arith.constant 0 : i32
    %c0_i32_0 = arith.constant 0 : i32
    return %arg0, %c0_i32 : i32, i32
  }
}

</mosaic_0001>

<bundles_post_ra>
// kernel: tpu_custom_call.1
= control target key start
LH: loop header
LB: loop body
LE: loop exit
PB: predicated region body
PF: predicated region fallthrough
CT: control target
= control target key end

     0   :  { %7 = vsyncpa [#allocation5], 0  ;;  %s308_s0 = inlined_call_operand.hbm [shape: f32[16,128], index: 0, kind: input, shape index: {}]   ;;  %s309_s1 = inlined_call_operand.hbm [shape: f32[16,128], index: 1, kind: input, shape index: {}]   ;;  %s310_s2 = inlined_call_operand.hbm [shape: f32[1,2], index: 2, kind: output, shape index: {}]  }
   0x1   :  { %8 = vsyncpa [#allocation8], 0 }
   0x2   :  { %9 = vsyncpa [#allocation6], 0  ;;  %s265_s9 = smov [#allocation4]  }
   0x3   :  { %s21_s10 = sshll.u32 %s265_s9, 4  ;;  %s22_s10 = int_to_ptr.vmem [resolvable:$true] %s21_s10 }
   0x4   :  { %s219_s11 = scalar_lea.vmem %s22_s10, 256  ;;  %p224_p1 = scmp.lt.s32.totalorder %s22_s10, %s22_s10 }
   0x5   :  { %p220_p0 = scmp.ne.s32.totalorder %s22_s10, %s219_s11  ;;  %p225_p2 = scmp.lt.s32.totalorder %s219_s11, %s219_s11 }
   0x7   :  { %p226_p3 = por %p225_p2, %p224_p1 }
   0x9   :  { %p227_p4 = pnand %p226_p3, %p220_p0 }
   0xb   :  { %230 = shalt.err (!%p227_p4)
}
   0xc   :  { %s266_s12 = smov 128   ;;  %s267_s13 = smov 8  }
   0xd   :  { %27 = dma.hbm_to_vmem [thread:$0]  %s308_s0, 256, %s22_s10, [#allocation5], %s266_s12, %s266_s12, %s267_s13  }
   0xe   :  { %s268_s16 = smov [#allocation7]  }
   0xf   :  { %s39_s17 = sshll.u32 %s268_s16, 4  ;;  %s40_s17 = int_to_ptr.vmem [resolvable:$true] %s39_s17 }
  0x10   :  { %s239_s18 = scalar_lea.vmem %s40_s17, 256  ;;  %p244_p6 = scmp.lt.s32.totalorder %s40_s17, %s40_s17 }
  0x11   :  { %p240_p5 = scmp.ne.s32.totalorder %s40_s17, %s239_s18  ;;  %p245_p7 = scmp.lt.s32.totalorder %s239_s18, %s239_s18 }
  0x13   :  { %p246_p8 = por %p245_p7, %p244_p6 }
  0x15   :  { %p247_p9 = pnand %p246_p8, %p240_p5 }
  0x17   :  { %250 = shalt.err (!%p247_p9)
}
  0x18   :  { %45 = dma.hbm_to_vmem [thread:$0]  %s309_s1, 256, %s40_s17, [#allocation8], %s266_s12, %s266_s12, %s267_s13  }
  0x19   :  { %259 = dma.done.wait [#allocation5], 256  }
  0x1a   :  { %260 = vsyncadd [#allocation5], 4294967040 }
  0x1b   :  { %261 = dma.done.wait [#allocation8], 256  }
  0x1c   :  { %262 = vsyncadd [#allocation8], 4294967040  ;;  %v67_v0 = vld [vmem:[#allocation4] sm:$0xff]  ;;  %v68_v1 = vld [vmem:[#allocation4 + $0x8] sm:$0xff]  ;;  %s269_s21 = smov [#allocation9]  }
  0x1d   :  { %v291_v2 = vld [vmem:[#allocation7] sm:$0xff]  ;;  %v69_v3 = vand.u32 2147483647, %v67_v0  ;;  %v70_v4 = vand.u32 2147483647, %v68_v1  ;;  %v293_v5 = vld [vmem:[#allocation7 + $0x8] sm:$0xff] }
  0x1e   :  { %v107_v6 = vand.u32 2147483647, %v291_v2  ;;  %v108_v9 = vand.u32 2147483647, %v293_v5  ;;  %v95_v31 = vsub.f32 0.0, %v67_v0  ;;  %v96_v33 = vsub.f32 0.0, %v68_v1 }
  0x1f   :  { %v71_v7 = vsub.f32 0.0, %v69_v3  ;;  %v72_v8 = vsub.f32 0.0, %v70_v4  ;;  %v133_v49 = vmax.f32 %v291_v2, 0.0  ;;  %v134_v56 = vmax.f32 %v293_v5, 0.0 }
  0x20   :  { %v109_v10 = vsub.f32 0.0, %v107_v6  ;;  %v110_v13 = vsub.f32 0.0, %v108_v9  ;;  %v97_v41 = vmax.f32 %v95_v31, 0.0  ;;  %v98_v45 = vmax.f32 %v96_v33, 0.0 }
  0x21   :  { %v73_v11 = vmul.f32 1.442695, %v71_v7  ;;  %v75_v12 = vmul.f32 1.442695, %v72_v8 }
  0x22   :  { %v111_v14 = vmul.f32 1.442695, %v109_v10  ;;  %v113_v15 = vmul.f32 1.442695, %v110_v13 }
  0x23   :  { %195 = vpow2.f32 %v73_v11 }
  0x24   :  { %197 = vpow2.f32 %v75_v12 }
  0x25   :  { %199 = vpow2.f32 %v111_v14 }
  0x26   :  { %201 = vpow2.f32 %v113_v15 }
  0x30   :  { %v196_v16 = vpop.eup %195 }
  0x31   :  { %v198_v17 = vpop.eup %197  ;;  %v77_v18 = vadd.f32 1.0, %v196_v16  ;;  %v80_v24 = vmul.f32 -0.5, %v196_v16  ;;  %v83_v29 = vand.u32 2147483647, %v196_v16 }
  0x32   :  { %v200_v19 = vpop.eup %199  ;;  %v86_v20 = vadd.f32 1.0, %v198_v17  ;;  %v89_v25 = vmul.f32 -0.5, %v198_v17  ;;  %v92_v32 = vand.u32 2147483647, %v198_v17 }
  0x33   :  { %v202_v21 = vpop.eup %201  ;;  %203 = vlog2.f32 %v77_v18  ;;  %v115_v22 = vadd.f32 1.0, %v200_v19  ;;  %v118_v26 = vmul.f32 -0.5, %v200_v19  ;;  %v81_v27 = vadd.f32 1.0, %v80_v24 }
  0x34   :  { %205 = vlog2.f32 %v86_v20  ;;  %v124_v23 = vadd.f32 1.0, %v202_v21  ;;  %v127_v28 = vmul.f32 -0.5, %v202_v21  ;;  %v90_v30 = vadd.f32 1.0, %v89_v25 }
  0x35   :  { %207 = vlog2.f32 %v115_v22  ;;  %v119_v34 = vadd.f32 1.0, %v118_v26  ;;  %v121_v35 = vand.u32 2147483647, %v200_v19  ;;  %v82_v36 = vmul.f32 %v196_v16, %v81_v27 }
  0x36   :  { %209 = vlog2.f32 %v124_v23  ;;  %v128_v37 = vadd.f32 1.0, %v127_v28  ;;  %vm297_vm0 = vcmp.lt.f32.partialorder %v83_v29, 0.0004427343  ;;  %v91_v40 = vmul.f32 %v198_v17, %v90_v30 }
  0x37   :  { %v130_v42 = vand.u32 2147483647, %v202_v21  ;;  %vm93_vm1 = vcmp.lt.f32.partialorder %v92_v32, 0.0004427343  ;;  %v120_v46 = vmul.f32 %v200_v19, %v119_v34  ;;  %vm122_vm2 = vcmp.lt.f32.partialorder %v121_v35, 0.0004427343 }
  0x38   :  { %v129_v52 = vmul.f32 %v202_v21, %v128_v37 }
  0x39   :  { %vm131_vm3 = vcmp.lt.f32.partialorder %v130_v42, 0.0004427343 }
  0x40   :  { %v204_v38 = vpop.eup %203 }
  0x41   :  { %v206_v43 = vpop.eup %205  ;;  %v79_v44 = vmul.f32 0.6931472, %v204_v38 }
  0x42   :  { %v208_v47 = vpop.eup %207  ;;  %v88_v48 = vmul.f32 0.6931472, %v206_v43 }
  0x43   :  { %v85_v50 = vsel %vm297_vm0, %v82_v36, %v79_v44  ;;  %v117_v51 = vmul.f32 0.6931472, %v208_v47  ;;  %v210_v53 = vpop.eup %209 }
  0x44   :  { %v94_v54 = vsel %vm93_vm1, %v91_v40, %v88_v48  ;;  %v99_v55 = vadd.f32 %v97_v41, %v85_v50  ;;  %v126_v59 = vmul.f32 0.6931472, %v210_v53 }
  0x45   :  { %v100_v57 = vadd.f32 %v98_v45, %v94_v54  ;;  %v123_v58 = vsel %vm122_vm2, %v120_v46, %v117_v51 }
  0x46   :  { %v135_v60 = vadd.f32 %v133_v49, %v123_v58  ;;  %v132_v62 = vsel %vm131_vm3, %v129_v52, %v126_v59 }
  0x47   :  { %v101_v61 = vadd.f32 %v100_v57, %v99_v55  ;;  %v136_v63 = vadd.f32 %v134_v56, %v132_v62 }
  0x49   :  { %144 = vadd.xlane.f32.xlu0 %v101_v61  ;;  %v137_v0 = vadd.f32 %v136_v63, %v135_v60 }
  0x4d   :  { %156 = vadd.xlane.f32.xlu0 %v137_v0 }
  0xd2   :  { %v145_v1 = vpop.xlane.xlu0 %144 }
  0xd3   :  { %v146_v2 = vrot.slane %v145_v1, 4 }
  0xd5   :  { %v147_v3 = vadd.f32 %v146_v2, %v145_v1 }
  0xd6   :  { %v157_v4 = vpop.xlane.xlu0 %156 }
  0xd7   :  { %v148_v6 = vrot.slane %v147_v3, 2  ;;  %v158_v7 = vrot.slane %v157_v4, 4 }
  0xd9   :  { %v159_v8 = vadd.f32 %v158_v7, %v157_v4  ;;  %v149_v9 = vadd.f32 %v148_v6, %v147_v3 }
  0xdb   :  { %v160_v10 = vrot.slane %v159_v8, 2  ;;  %v150_v5 = vrot.slane %v149_v9, 1 }
  0xdd   :  { %v161_v11 = vadd.f32 %v160_v10, %v159_v8  ;;  %v151_v12 = vadd.f32 %v150_v5, %v149_v9 }
  0xdf   :  { %186 = vpush %v151_v12  ;;  %v162_v13 = vrot.slane %v161_v11, 1 }
  0xe1   :  { %v163_v14 = vadd.f32 %v162_v13, %v161_v11 }
  0xe3   :  { %188 = vpush %v163_v14 }
 0x110   :  { %s187_s0 = spop %186 }
 0x111   :  { %154 = sst [smem:[#allocation9]] %s187_s0 }
 0x114   :  { %s189_s1 = spop %188 }
 0x115   :  { %166 = sst [smem:[#allocation9 + $0x1]] %s189_s1 }
 0x116   :  { %174 = dma.smem_to_hbm %s269_s21, 16, %s310_s2, [#allocation6]  }
 0x117   :  { %263 = dma.done.wait [#allocation6], 16  }
 0x118   :  { %264 = vsyncadd [#allocation6], 4294967280 }
 0x119   :  { %178 = sfence }
 0x11a   :  { %179 = vsyncpa [#allocation5], 1 }
 0x11b   :  { %180 = vsyncpa [#allocation8], 1 }
 0x11c   :  { %181 = vsyncpa [#allocation6], 1 }

</bundles_post_ra>
